<compile_context>
chip_gen: v7x
topology: tpu7x:2x2x1
jax: 0.10.0
libtpu: 0.0.40
codegen_flags: <defaults>
</compile_context>

<pallas_src>
import jax
import jax.numpy as jnp
from jax.experimental import pallas as pl
from jax.experimental.pallas import tpu as pltpu

NUM_ACTIONS = 2
H = 24                  # hidden width of fc1 / fc2
IN_FEATURES = 2
DEFAULT_TILE_B = 1024   # batch rows per grid step


def _dqn_kernel(x_ref, w1_ref, b1_ref, w2_ref, b2_ref, w3_ref, b3_ref, o_ref):
    x = x_ref[...]                                   # (TILE_B, 2) f32
    # fc1: K=2 contraction -> two VPU broadcast FMAs (skip the MXU entirely).
    h1 = (x[:, 0:1] * w1_ref[0:1, :]
          + x[:, 1:2] * w1_ref[1:2, :]
          + b1_ref[...])                             # (TILE_B, 24)
    h1 = jnp.maximum(h1, 0.0)
    # fc2 + relu (MXU, f32 accumulation)
    h2 = jnp.dot(h1, w2_ref[...], preferred_element_type=jnp.float32) + b2_ref[...]
    h2 = jnp.maximum(h2, 0.0)
    # fc3 (no activation)
    out = jnp.dot(h2, w3_ref[...], preferred_element_type=jnp.float32) + b3_ref[...]
    o_ref[...] = out.astype(o_ref.dtype)


def _round_up(n, m):
    return ((n + m - 1) // m) * m


def dqn_forward(x, params, *, tile_b=DEFAULT_TILE_B):
    """x: (B, 2) float32; params: dict of w1,b1,w2,b2,w3,b3 (weights stored (in,out))."""
    B = x.shape[0]
    w1, b1, w2, b2, w3, b3 = (params["w1"], params["b1"], params["w2"],
                              params["b2"], params["w3"], params["b3"])

    # Batch tile: no larger than needed, and always a multiple of 8 (sublane
    # granularity) so the BlockSpec second-minor dim is legal.
    tile_b = _round_up(min(tile_b, _round_up(B, 8)), 8)
    padded_b = _round_up(B, tile_b)
    if padded_b != B:
        x = jnp.pad(x, ((0, padded_b - B), (0, 0)))   # extra rows sliced off below
    grid = (padded_b // tile_b,)

    # Weights/biases: full-array blocks with constant index_map -> DMA'd once,
    # resident in VMEM across all grid steps.
    def resident(a):
        return pl.BlockSpec(a.shape, lambda i: (0,) * a.ndim)

    out = pl.pallas_call(
        _dqn_kernel,
        out_shape=jax.ShapeDtypeStruct((padded_b, NUM_ACTIONS), jnp.float32),
        grid=grid,
        in_specs=[
            pl.BlockSpec((tile_b, IN_FEATURES), lambda i: (i, 0)),  # x: tiled over batch
            resident(w1), resident(b1),
            resident(w2), resident(b2),
            resident(w3), resident(b3),
        ],
        out_specs=pl.BlockSpec((tile_b, NUM_ACTIONS), lambda i: (i, 0)),
        compiler_params=pltpu.CompilerParams(
            dimension_semantics=("parallel",)),     # batch axis -> both TCs on v7x
    )(x, w1, b1, w2, b2, w3, b3)

    return out[:B]


def init_dqn_params(key):
    """Deterministic init mimicking PyTorch nn.Linear default U(-1/sqrt(fan_in), +)."""
    def linear(key, fan_in, fan_out):
        kw, kb = jax.random.split(key)
        bound = 1.0 / jnp.sqrt(float(fan_in))
        # stored transposed relative to torch: (fan_in, fan_out)
        w = jax.random.uniform(kw, (fan_in, fan_out), jnp.float32, -bound, bound)
        b = jax.random.uniform(kb, (1, fan_out), jnp.float32, -bound, bound)
        return w, b

    k1, k2, k3 = jax.random.split(key, 3)
    w1, b1 = linear(k1, IN_FEATURES, H)
    w2, b2 = linear(k2, H, H)
    w3, b3 = linear(k3, H, NUM_ACTIONS)
    return dict(w1=w1, b1=b1, w2=w2, b2=b2, w3=w3, b3=b3)


def dqn_reference(x, p):
    h1 = jnp.maximum(x @ p["w1"] + p["b1"], 0.0)
    h2 = jnp.maximum(h1 @ p["w2"] + p["b2"], 0.0)
    return h2 @ p["w3"] + p["b3"]


if __name__ == "__main__":
    key = jax.random.PRNGKey(0)
    kp, kx = jax.random.split(key)
    params = init_dqn_params(kp)

    # Small shape consistent with the module's forward: batch of 8 states, 2 features.
    batch = 8
    x = jax.random.normal(kx, (batch, IN_FEATURES), jnp.float32)

    out = jax.block_until_ready(dqn_forward(x, params))
    ref = dqn_reference(x, params)
    assert out.shape == (batch, NUM_ACTIONS)
    assert jnp.allclose(out, ref, atol=1e-5, rtol=1e-5), "mismatch vs JAX reference"

    # Exercise a non-tile-multiple, multi-step grid path to verify padding + pipelining.
    x2 = jax.random.normal(jax.random.PRNGKey(1), (1000, IN_FEATURES), jnp.float32)
    out2 = jax.block_until_ready(dqn_forward(x2, params, tile_b=256))
    ref2 = dqn_reference(x2, params)
    assert out2.shape == (1000, NUM_ACTIONS)
    assert jnp.allclose(out2, ref2, atol=1e-5, rtol=1e-5), "mismatch vs JAX reference (tiled)"

    print("KERNEL_OK")
</pallas_src>

<mosaic_0001>
module attributes {stable_mosaic.version = 11 : i64} {
  func.func @_dqn_kernel(%arg0: i32, %arg1: memref<8x2xf32, #tpu.memory_space<vmem>>, %arg2: memref<2x24xf32, #tpu.memory_space<vmem>>, %arg3: memref<1x24xf32, #tpu.memory_space<vmem>>, %arg4: memref<24x24xf32, #tpu.memory_space<vmem>>, %arg5: memref<1x24xf32, #tpu.memory_space<vmem>>, %arg6: memref<24x2xf32, #tpu.memory_space<vmem>>, %arg7: memref<1x2xf32, #tpu.memory_space<vmem>>, %arg8: memref<8x2xf32, #tpu.memory_space<vmem>>) attributes {dimension_semantics = [#tpu.dimension_semantics<parallel>], iteration_bounds = array<i64: 1>, scalar_prefetch = 0 : i64, scratch_operands = 0 : i64, tpu.core_type = #tpu.core_type<tc>, window_params = [{transform_indices = @transform_0, window_bounds = array<i64: 8, 2>}, {pipeline_mode = #tpu.pipeline_mode<synchronous>, transform_indices = @transform_1, window_bounds = array<i64: 2, 24>}, {pipeline_mode = #tpu.pipeline_mode<synchronous>, transform_indices = @transform_2, window_bounds = array<i64: 1, 24>}, {pipeline_mode = #tpu.pipeline_mode<synchronous>, transform_indices = @transform_3, window_bounds = array<i64: 24, 24>}, {pipeline_mode = #tpu.pipeline_mode<synchronous>, transform_indices = @transform_4, window_bounds = array<i64: 1, 24>}, {pipeline_mode = #tpu.pipeline_mode<synchronous>, transform_indices = @transform_5, window_bounds = array<i64: 24, 2>}, {pipeline_mode = #tpu.pipeline_mode<synchronous>, transform_indices = @transform_6, window_bounds = array<i64: 1, 2>}, {transform_indices = @transform_7, window_bounds = array<i64: 8, 2>}]} {
    %c0 = arith.constant 0 : index
    %c0_0 = arith.constant 0 : index
    %0 = vector.load %arg1[%c0, %c0_0] : memref<8x2xf32, #tpu.memory_space<vmem>>, vector<8x2xf32>
    %1 = vector.extract_strided_slice %0 {offsets = [0, 0], sizes = [8, 1], strides = [1, 1]} : vector<8x2xf32> to vector<8x1xf32>
    %c0_1 = arith.constant 0 : index
    %c0_2 = arith.constant 0 : index
    %2 = vector.load %arg2[%c0_1, %c0_2] : memref<2x24xf32, #tpu.memory_space<vmem>>, vector<1x24xf32>
    %3 = vector.broadcast %1 : vector<8x1xf32> to vector<8x24xf32>
    %4 = vector.broadcast %2 : vector<1x24xf32> to vector<8x24xf32>
    %5 = arith.mulf %3, %4 : vector<8x24xf32>
    %6 = vector.extract_strided_slice %0 {offsets = [0, 1], sizes = [8, 1], strides = [1, 1]} : vector<8x2xf32> to vector<8x1xf32>
    %c1 = arith.constant 1 : index
    %c0_3 = arith.constant 0 : index
    %7 = vector.load %arg2[%c1, %c0_3] : memref<2x24xf32, #tpu.memory_space<vmem>>, vector<1x24xf32>
    %8 = vector.broadcast %6 : vector<8x1xf32> to vector<8x24xf32>
    %9 = vector.broadcast %7 : vector<1x24xf32> to vector<8x24xf32>
    %10 = arith.mulf %8, %9 : vector<8x24xf32>
    %11 = arith.addf %5, %10 : vector<8x24xf32>
    %c0_4 = arith.constant 0 : index
    %c0_5 = arith.constant 0 : index
    %12 = vector.load %arg3[%c0_4, %c0_5] : memref<1x24xf32, #tpu.memory_space<vmem>>, vector<1x24xf32>
    %13 = vector.broadcast %12 : vector<1x24xf32> to vector<8x24xf32>
    %14 = arith.addf %11, %13 : vector<8x24xf32>
    %cst = arith.constant 0.000000e+00 : f32
    %15 = vector.broadcast %cst : f32 to vector<8x24xf32>
    %16 = arith.maximumf %14, %15 : vector<8x24xf32>
    %c0_6 = arith.constant 0 : index
    %c0_7 = arith.constant 0 : index
    %17 = vector.load %arg4[%c0_6, %c0_7] : memref<24x24xf32, #tpu.memory_space<vmem>>, vector<24x24xf32>
    %cst_8 = arith.constant dense<0.000000e+00> : vector<8x24xf32>
    %18 = tpu.matmul %16, %17, %cst_8 {dimension_numbers = #tpu.dot_dimension_numbers<[1], [0], [0], [1], [0, 0, 1, 1], [], []>} : vector<8x24xf32>, vector<24x24xf32>, vector<8x24xf32> -> vector<8x24xf32>
    %c0_9 = arith.constant 0 : index
    %c0_10 = arith.constant 0 : index
    %19 = vector.load %arg5[%c0_9, %c0_10] : memref<1x24xf32, #tpu.memory_space<vmem>>, vector<1x24xf32>
    %20 = vector.broadcast %19 : vector<1x24xf32> to vector<8x24xf32>
    %21 = arith.addf %18, %20 : vector<8x24xf32>
    %cst_11 = arith.constant 0.000000e+00 : f32
    %22 = vector.broadcast %cst_11 : f32 to vector<8x24xf32>
    %23 = arith.maximumf %21, %22 : vector<8x24xf32>
    %c0_12 = arith.constant 0 : index
    %c0_13 = arith.constant 0 : index
    %24 = vector.load %arg6[%c0_12, %c0_13] : memref<24x2xf32, #tpu.memory_space<vmem>>, vector<24x2xf32>
    %cst_14 = arith.constant dense<0.000000e+00> : vector<8x2xf32>
    %25 = tpu.matmul %23, %24, %cst_14 {dimension_numbers = #tpu.dot_dimension_numbers<[1], [0], [0], [1], [0, 0, 1, 1], [], []>} : vector<8x24xf32>, vector<24x2xf32>, vector<8x2xf32> -> vector<8x2xf32>
    %c0_15 = arith.constant 0 : index
    %c0_16 = arith.constant 0 : index
    %26 = vector.load %arg7[%c0_15, %c0_16] : memref<1x2xf32, #tpu.memory_space<vmem>>, vector<1x2xf32>
    %27 = vector.broadcast %26 : vector<1x2xf32> to vector<8x2xf32>
    %28 = arith.addf %25, %27 : vector<8x2xf32>
    %c0_17 = arith.constant 0 : index
    %c0_18 = arith.constant 0 : index
    %29 = vector.load %arg8[%c0_17, %c0_18] : memref<8x2xf32, #tpu.memory_space<vmem>>, vector<8x2xf32>
    tpu.vector_store %arg8[%c0_17, %c0_18], %28 {strides = array<i32>} : memref<8x2xf32, #tpu.memory_space<vmem>>, vector<8x2xf32>,
    return
  }
  func.func @transform_0(%arg0: i32) -> (i32, i32) {
    %c0_i32 = arith.constant 0 : i32
    %c0_i32_0 = arith.constant 0 : i32
    return %arg0, %c0_i32 : i32, i32
  }
  func.func @transform_1(%arg0: i32) -> (i32, i32) {
    %c0_i32 = arith.constant 0 : i32
    %c0_i32_0 = arith.constant 0 : i32
    %c0_i32_1 = arith.constant 0 : i32
    return %c0_i32, %c0_i32_0 : i32, i32
  }
  func.func @transform_2(%arg0: i32) -> (i32, i32) {
    %c0_i32 = arith.constant 0 : i32
    %c0_i32_0 = arith.constant 0 : i32
    %c0_i32_1 = arith.constant 0 : i32
    return %c0_i32, %c0_i32_0 : i32, i32
  }
  func.func @transform_3(%arg0: i32) -> (i32, i32) {
    %c0_i32 = arith.constant 0 : i32
    %c0_i32_0 = arith.constant 0 : i32
    %c0_i32_1 = arith.constant 0 : i32
    return %c0_i32, %c0_i32_0 : i32, i32
  }
  func.func @transform_4(%arg0: i32) -> (i32, i32) {
    %c0_i32 = arith.constant 0 : i32
    %c0_i32_0 = arith.constant 0 : i32
    %c0_i32_1 = arith.constant 0 : i32
    return %c0_i32, %c0_i32_0 : i32, i32
  }
  func.func @transform_5(%arg0: i32) -> (i32, i32) {
    %c0_i32 = arith.constant 0 : i32
    %c0_i32_0 = arith.constant 0 : i32
    %c0_i32_1 = arith.constant 0 : i32
    return %c0_i32, %c0_i32_0 : i32, i32
  }
  func.func @transform_6(%arg0: i32) -> (i32, i32) {
    %c0_i32 = arith.constant 0 : i32
    %c0_i32_0 = arith.constant 0 : i32
    %c0_i32_1 = arith.constant 0 : i32
    return %c0_i32, %c0_i32_0 : i32, i32
  }
  func.func @transform_7(%arg0: i32) -> (i32, i32) {
    %c0_i32 = arith.constant 0 : i32
    %c0_i32_0 = arith.constant 0 : i32
    return %arg0, %c0_i32 : i32, i32
  }
}

</mosaic_0001>

<bundles_post_ra>
// kernel: tpu_custom_call.1
= control target key start
LH: loop header
LB: loop body
LE: loop exit
PB: predicated region body
PF: predicated region fallthrough
CT: control target
= control target key end

     0   :  { %v278_v0 = vmov 0   ;;  %v279_v2 = vmov 1   ;;  %v280_v6 = vmov 0.0|0.0   ;;  %v281_v7 = vmov 0.0   ;;  %s364_s0 = inlined_call_operand.vmem [shape: f32[8,2], index: 0, kind: input, shape index: {}]   ;;  %s365_s3 = inlined_call_operand.vmem [shape: f32[24,24], index: 3, kind: input, shape index: {}]   ;;  %s366_s1 = inlined_call_operand.vmem [shape: f32[2,24], index: 1, kind: input, shape index: {}]   ;;  %s367_s2 = inlined_call_operand.vmem [shape: f32[1,24], index: 2, kind: input, shape index: {}]   ;;  %s368_s5 = inlined_call_operand.vmem [shape: f32[24,2], index: 5, kind: input, shape index: {}]   ;;  %s369_s4 = inlined_call_operand.vmem [shape: f32[1,24], index: 4, kind: input, shape index: {}]   ;;  %s370_s6 = inlined_call_operand.vmem [shape: f32[1,2], index: 6, kind: input, shape index: {}]   ;;  %s371_s7 = inlined_call_operand.vmem [shape: f32[8,2], index: 7, kind: output, shape index: {}]  }
   0x1   :  { %276 = vset.pattern.permute.xlu0 %v278_v0  ;;  %v26_v1 = vld [vmem:[%s364_s0] sm:$0xff]  ;;  %v59_v4 = vld [vmem:[%s365_s3 + $0x8] sm:$0xff]  ;;  %265 = vmatprep.subr.bf16.mxu0 %v280_v6  ;;  %v60_v8 = vld [vmem:[%s365_s3 + $0x10] sm:$0xff]  ;;  %vm282_vm0 = vmmov 0   ;;  %vm68_vm1 = vcmask 195584   ;;  %vm226_vm2 = vcmask 15360  }
   0x2   :  { %30 = vperm.xlu0 %276, %v26_v1   ;;  %v58_v3 = vld [vmem:[%s365_s3] sm:$0xff]  ;;  %268 = vmatprep.subr.bf16.mxu1 %v280_v6  ;;  %v144_v20 = vld [vmem:[%s368_s5 + $0x8] sm:$0xff]  ;;  %v145_v22 = vld [vmem:[%s368_s5 + $0x10] sm:$0xff] }
   0x3   :  { %v266_v5 = vpack.c.bf16 %v59_v4, %v58_v3  ;;  %253 = vmatprep.mubr.msk.f32.mxu0 %vm282_vm0, %v281_v7  ;;  %262 = vmatprep.mubr.msk.f32.mxu1 %vm282_vm0, %v281_v7  ;;  %v232_v10 = vld [vmem:[%s366_s1] ss:$0 sm:$0xff]  ;;  %v233_v11 = vld [vmem:[%s366_s1 + $0x1] ss:$0 sm:$0xff] }
   0x4   :  { %v234_v15 = vld [vmem:[%s367_s2] ss:$0 sm:$0xff] }
   0x5   :  { %267 = vmatpush3.bf16.msra.mxu0 %v266_v5  ;;  %v143_v19 = vld [vmem:[%s368_s5] sm:$0xff] }
   0x6   :  { %277 = vset.pattern.permute.xlu0 %v279_v2  ;;  %251 = vmatprep.subr.mxu0 %v281_v7  ;;  %v269_v21 = vpack.c.bf16 %v144_v20, %v143_v19  ;;  %v235_v23 = vld [vmem:[%s369_s4] ss:$0 sm:$0xff] }
   0x7   :  { %40 = vperm.xlu0 %277, %v26_v1   ;;  %v237_v28 = vld [vmem:[%s370_s6] ss:$0 sm:$0xff] }
   0x8   :  { %270 = vmatpush3.bf16.msra.mxu1 %v269_v21 }
   0x9   :  { %252 = vmatpush3.msra.mxu0 %v60_v8  ;;  %260 = vmatprep.subr.mxu1 %v281_v7 }
   0xc   :  { %261 = vmatpush3.msra.mxu1 %v145_v22 }
  0x81   :  { %v31_v9 = vpop.permute.xlu0 %30 }
  0x82   :  { %v37_v13 = vmul.f32 %v232_v10, %v31_v9 }
  0x86   :  { %v41_v12 = vpop.permute.xlu0 %40 }
  0x87   :  { %v47_v14 = vmul.f32 %v233_v11, %v41_v12 }
  0x89   :  { %v48_v16 = vadd.f32 %v47_v14, %v37_v13 }
  0x8b   :  { %v56_v17 = vadd.f32 %v234_v15, %v48_v16 }
  0x8d   :  { %v57_v18 = vmax.f32 %v56_v17, 0.0 }
  0x8f   :  { %254 = vmatmul.mubr.msk.f32.vlgmr.msra.gmra.mrb[0].mxu0 %vm68_vm1, %v57_v18 }
 0x162   :  { %v138_v24 = vpop.f32.mrb[0].mxu0 }
 0x163   :  { %v139_v25 = vadd.f32 %v235_v23, %v138_v24  ;;  %v255_v26 = vpop.f32.mrb[1].mxu0 }
 0x165   :  { %v142_v27 = vmax.f32 %v139_v25, 0.0 }
 0x167   :  { %263 = vmatmul.mubr.msk.f32.vlgmr.msra.gmra.mrb[0].mxu1 %vm68_vm1, %v142_v27 }
 0x23a   :  { %v222_v29 = vpop.f32.mrb[0].mxu1 }
 0x23b   :  { %v223_v30 = vadd.f32 %v237_v28, %v222_v29  ;;  %v264_v31 = vpop.f32.mrb[1].mxu1 }
 0x23d   :  { %227 = vst.msk [vmem:[%s371_s7] sm:$0xff] %vm226_vm2, %v223_v30 }

</bundles_post_ra>
